<compile_context>
chip_gen: v6e
topology: v6e:2x2x1
jax: 0.10.0
libtpu: 0.0.40
codegen_flags: <defaults>
</compile_context>

<pallas_src>
import functools
import math

import jax
import jax.numpy as jnp
from jax.experimental import pallas as pl
from jax.experimental.pallas import tpu as pltpu

_LANE = 128


def _rmsnorm_kernel(x_ref, scale_ref, o_ref, *, inv_dim):
    # x_ref:     (rt, dim_p)  input rows (feature axis zero-padded to dim_p)
    # scale_ref: (1,  dim_p)  per-feature scale (zero-padded), broadcast over rows
    # o_ref:     (rt, dim_p)  output tile
    xf = x_ref[...].astype(jnp.float32)
    # Zero-padded lanes contribute nothing to the sum; divide by the REAL dim.
    ss = jnp.sum(xf * xf, axis=-1, keepdims=True)            # (rt, 1)
    inv = jax.lax.rsqrt(ss * inv_dim)                         # EUP rsqrt, (rt, 1)
    scale = scale_ref[...].astype(jnp.float32)                # (1, dim_p)
    o_ref[...] = (xf * (inv * scale)).astype(o_ref.dtype)


def _round_up(a, b):
    return ((a + b - 1) // b) * b


def rmsnorm(x, scale, *, vmem_tile_budget_bytes=24 * 1024 * 1024):
    """RMSNorm over the last dim of x (shape (..., dim)) with per-feature scale.

    Matches torch: x / sqrt(mean(x**2, dim=-1, keepdim=True)) * scale.
    """
    orig_shape = x.shape
    dim = orig_shape[-1]
    rows = int(math.prod(orig_shape[:-1]))
    x2d = x.reshape(rows, dim)
    scale2d = scale.reshape(1, dim)

    itemsize = jnp.dtype(x.dtype).itemsize
    # Sublane pack for this dtype: 8 (f32), 16 (bf16), 32 (int8/fp8).
    sublane = max(8, 32 // max(itemsize, 1))

    # Lane-dense feature axis: pad dim up to a multiple of 128 with zeros.
    dim_p = _round_up(dim, _LANE)
    if dim_p != dim:
        x2d = jnp.pad(x2d, ((0, 0), (0, dim_p - dim)))
        scale2d = jnp.pad(scale2d, ((0, 0), (0, dim_p - dim)))

    # Row tile: as big as the VMEM budget allows (double-buffered input +
    # output tiles => 4 tile copies live), capped at 1024 rows, multiple of
    # the sublane pack.
    bytes_per_row = dim_p * itemsize
    rt = vmem_tile_budget_bytes // (4 * bytes_per_row)
    rt = int(max(sublane, min(rt, 1024)))
    rt -= rt % sublane
    # For large inputs keep >= ~16 grid steps so v7x's 2 TensorCores share work.
    if rows >= 16 * sublane:
        rt = min(rt, max(sublane, (rows // 16) // sublane * sublane))
    # Never bigger than the (sublane-rounded) row count.
    rt = min(rt, _round_up(rows, sublane))

    # Pad rows up to a multiple of rt; padded rows are dropped after the call
    # (pad with ones so they stay finite).
    rows_p = _round_up(rows, rt)
    if rows_p != rows:
        x2d = jnp.pad(x2d, ((0, rows_p - rows), (0, 0)), constant_values=1)

    grid = (rows_p // rt,)
    kernel = functools.partial(_rmsnorm_kernel, inv_dim=1.0 / float(dim))

    cost = pl.CostEstimate(
        flops=3 * rows_p * dim_p,
        transcendentals=rows_p,
        bytes_accessed=2 * rows_p * dim_p * itemsize + dim_p * itemsize,
    )

    out2d = pl.pallas_call(
        kernel,
        out_shape=jax.ShapeDtypeStruct((rows_p, dim_p), x.dtype),
        grid_spec=pltpu.PrefetchScalarGridSpec(
            num_scalar_prefetch=0,
            grid=grid,
            in_specs=[
                pl.BlockSpec((rt, dim_p), lambda i: (i, 0)),
                pl.BlockSpec((1, dim_p), lambda i: (0, 0)),
            ],
            out_specs=pl.BlockSpec((rt, dim_p), lambda i: (i, 0)),
        ),
        compiler_params=pltpu.CompilerParams(
            dimension_semantics=("parallel",),
            # Safe on every generation (v7x has 64 MiB physical VMEM) and well
            # above the tile budget so double-buffering is never starved.
            vmem_limit_bytes=48 * 1024 * 1024,
        ),
        cost_estimate=cost,
    )(x2d, scale2d)

    return out2d[:rows, :dim].reshape(orig_shape)


if __name__ == "__main__":
    batch_size, seq_len, dim = 2, 8, 32

    key = jax.random.PRNGKey(0)
    x = jax.random.normal(key, (batch_size, seq_len, dim), dtype=jnp.float32)
    # Matches nn.Parameter(torch.ones(dim)).
    scale = jnp.ones((dim,), dtype=jnp.float32)

    out = jax.block_until_ready(rmsnorm(x, scale))

    # Pure-JAX reference (same math as the PyTorch forward).
    rms = jnp.sqrt(jnp.mean(x ** 2, axis=-1, keepdims=True))
    ref = x / rms * scale
    assert out.shape == x.shape
    assert out.dtype == x.dtype
    assert jnp.allclose(out, ref, atol=1e-5, rtol=1e-5)

    # Ragged / non-lane-aligned case: exercises both the row-padding and the
    # dim-padding (masked-store-avoidance) paths.
    x2 = jax.random.normal(jax.random.PRNGKey(1), (3, 5, 200), dtype=jnp.float32)
    s2 = jax.random.normal(jax.random.PRNGKey(2), (200,), dtype=jnp.float32)
    out2 = jax.block_until_ready(rmsnorm(x2, s2))
    rms2 = jnp.sqrt(jnp.mean(x2 ** 2, axis=-1, keepdims=True))
    ref2 = x2 / rms2 * s2
    assert out2.shape == x2.shape
    assert jnp.allclose(out2, ref2, atol=2e-5, rtol=2e-5)

    print("KERNEL_OK")
</pallas_src>

<mosaic_0001>
module attributes {stable_mosaic.version = 11 : i64} {
  func.func @_rmsnorm_kernel(%arg0: i32, %arg1: memref<16x128xf32, #tpu.memory_space<vmem>>, %arg2: memref<1x128xf32, #tpu.memory_space<vmem>>, %arg3: memref<16x128xf32, #tpu.memory_space<vmem>>) attributes {dimension_semantics = [#tpu.dimension_semantics<parallel>], iteration_bounds = array<i64: 1>, scalar_prefetch = 0 : i64, scratch_operands = 0 : i64, tpu.core_type = #tpu.core_type<tc>, window_params = [{transform_indices = @transform_0, window_bounds = array<i64: 16, 128>}, {pipeline_mode = #tpu.pipeline_mode<synchronous>, transform_indices = @transform_1, window_bounds = array<i64: 1, 128>}, {transform_indices = @transform_2, window_bounds = array<i64: 16, 128>}]} {
    %c0 = arith.constant 0 : index
    %c0_0 = arith.constant 0 : index
    %0 = vector.load %arg1[%c0, %c0_0] : memref<16x128xf32, #tpu.memory_space<vmem>>, vector<16x128xf32>
    %1 = arith.mulf %0, %0 : vector<16x128xf32>
    %cst = arith.constant dense<0.000000e+00> : vector<16xf32>
    %2 = vector.multi_reduction <add>, %1, %cst [1] : vector<16x128xf32> to vector<16xf32>
    %3 = vector.shape_cast %2 : vector<16xf32> to vector<16x1xf32>
    %cst_1 = arith.constant 3.125000e-02 : f32
    %4 = vector.broadcast %cst_1 : f32 to vector<16x1xf32>
    %5 = arith.mulf %3, %4 : vector<16x1xf32>
    %6 = math.rsqrt %5 : vector<16x1xf32>
    %c0_2 = arith.constant 0 : index
    %c0_3 = arith.constant 0 : index
    %7 = vector.load %arg2[%c0_2, %c0_3] : memref<1x128xf32, #tpu.memory_space<vmem>>, vector<1x128xf32>
    %8 = vector.broadcast %6 : vector<16x1xf32> to vector<16x128xf32>
    %9 = vector.broadcast %7 : vector<1x128xf32> to vector<16x128xf32>
    %10 = arith.mulf %8, %9 : vector<16x128xf32>
    %11 = arith.mulf %0, %10 : vector<16x128xf32>
    %c0_4 = arith.constant 0 : index
    %c0_5 = arith.constant 0 : index
    %12 = vector.load %arg3[%c0_4, %c0_5] : memref<16x128xf32, #tpu.memory_space<vmem>>, vector<16x128xf32>
    tpu.vector_store %arg3[%c0_4, %c0_5], %11 {strides = array<i32>} : memref<16x128xf32, #tpu.memory_space<vmem>>, vector<16x128xf32>,
    return
  }
  func.func @transform_0(%arg0: i32) -> (i32, i32) {
    %c0_i32 = arith.constant 0 : i32
    %c0_i32_0 = arith.constant 0 : i32
    return %arg0, %c0_i32 : i32, i32
  }
  func.func @transform_1(%arg0: i32) -> (i32, i32) {
    %c0_i32 = arith.constant 0 : i32
    %c0_i32_0 = arith.constant 0 : i32
    %c0_i32_1 = arith.constant 0 : i32
    return %c0_i32, %c0_i32_0 : i32, i32
  }
  func.func @transform_2(%arg0: i32) -> (i32, i32) {
    %c0_i32 = arith.constant 0 : i32
    %c0_i32_0 = arith.constant 0 : i32
    return %arg0, %c0_i32 : i32, i32
  }
}

</mosaic_0001>

<bundles_post_ra>
// kernel: tpu_custom_call.1
= control target key start
LH: loop header
LB: loop body
LE: loop exit
PB: predicated region body
PF: predicated region fallthrough
CT: control target
= control target key end

     0   :  { %7 = vsyncpa [#allocation3], 0  ;;  %s155_s0 = inlined_call_operand.hbm [shape: f32[16,128], index: 0, kind: input, shape index: {}]   ;;  %s156_s1 = inlined_call_operand.vmem [shape: f32[1,128], index: 1, kind: input, shape index: {}]   ;;  %s157_s2 = inlined_call_operand.hbm [shape: f32[16,128], index: 2, kind: output, shape index: {}]  }
   0x1   :  { %8 = vsyncpa [#allocation4], 0  ;;  %s121_s9 = smov [#allocation2]  }
   0x2   :  { %s14_s10 = sshll.u32 %s121_s9, 4  ;;  %s15_s10 = int_to_ptr.vmem [resolvable:$true] %s14_s10 }
   0x3   :  { %s85_s11 = scalar_lea.vmem %s15_s10, 256  ;;  %p90_p1 = scmp.lt.s32.totalorder %s15_s10, %s15_s10 }
   0x4   :  { %p86_p0 = scmp.ne.s32.totalorder %s15_s10, %s85_s11  ;;  %p91_p2 = scmp.lt.s32.totalorder %s85_s11, %s85_s11 }
   0x6   :  { %p92_p3 = por %p91_p2, %p90_p1 }
   0x8   :  { %p93_p4 = pnand %p92_p3, %p86_p0 }
   0xa   :  { %96 = shalt.err (!%p93_p4)
}
   0xb   :  { %s122_s12 = smov 128   ;;  %s123_s13 = smov 8  }
   0xc   :  { %20 = dma.hbm_to_vmem [thread:$0]  %s155_s0, 256, %s15_s10, [#allocation3], %s122_s12, %s122_s12, %s123_s13  }
   0xd   :  { %117 = dma.done.wait [#allocation3], 256  }
   0xe   :  { %118 = vsyncadd [#allocation3], 4294967040  ;;  %v26_v0 = vld [vmem:[#allocation2] sm:$0xff]  ;;  %v27_v1 = vld [vmem:[#allocation2 + $0x8] sm:$0xff]  ;;  %s124_s0 = smov [#allocation5]  }
   0xf   :  { %v28_v2 = vmul.f32 %v26_v0, %v26_v0  ;;  %v29_v3 = vmul.f32 %v27_v1, %v27_v1  ;;  %v68_v8 = vld [vmem:[%s156_s1] ss:$0 sm:$0xff]  ;;  %s56_s18 = sshll.u32 %s124_s0, 4  ;;  %s57_s18 = int_to_ptr.vmem [resolvable:$true] %s56_s18 }
  0x10   :  { %s97_s19 = scalar_lea.vmem %s57_s18, 256  ;;  %p102_p6 = scmp.lt.s32.totalorder %s57_s18, %s57_s18 }
  0x11   :  { %30 = vadd.xlane.f32.xlu0 %v28_v2  ;;  %p98_p5 = scmp.ne.s32.totalorder %s57_s18, %s97_s19  ;;  %p103_p7 = scmp.lt.s32.totalorder %s97_s19, %s97_s19 }
  0x13   :  { %p104_p8 = por %p103_p7, %p102_p6 }
  0x15   :  { %32 = vadd.xlane.f32.xlu0 %v29_v3  ;;  %p105_p9 = pnand %p104_p8, %p98_p5 }
  0x9a   :  { %v31_v4 = vpop.xlane.xlu0 %30 }
  0x9b   :  { %v34_v5 = vmul.f32 0.03125, %v31_v4 }
  0x9d   :  { %73 = vrsqrt.f32 %v34_v5 }
  0x9e   :  { %v33_v6 = vpop.xlane.xlu0 %32 }
  0x9f   :  { %v35_v7 = vmul.f32 0.03125, %v33_v6 }
  0xa1   :  { %75 = vrsqrt.f32 %v35_v7 }
  0xaa   :  { %v74_v9 = vpop.eup %73 }
  0xab   :  { %v45_v10 = vmul.f32 %v74_v9, %v68_v8 }
  0xad   :  { %v47_v11 = vmul.f32 %v45_v10, %v26_v0 }
  0xae   :  { %v76_v12 = vpop.eup %75 }
  0xaf   :  { %v46_v13 = vmul.f32 %v76_v12, %v68_v8  ;;  %49 = vst [vmem:[#allocation5] sm:$0xff] %v47_v11 }
  0xb1   :  { %v48_v14 = vmul.f32 %v46_v13, %v27_v1 }
  0xb3   :  { %50 = vst [vmem:[#allocation5 + $0x8] sm:$0xff] %v48_v14 }
  0xb4   :  { %108 = shalt.err (!%p105_p9)
}
  0xb5   :  { %62 = dma.vmem_to_hbm [thread:$0]  %s57_s18, 256, %s157_s2, [#allocation4], %s122_s12, %s122_s12, %s123_s13  }
  0xb6   :  { %119 = dma.done.wait [#allocation4], 256  }
  0xb7   :  { %120 = vsyncadd [#allocation4], 4294967040 }
  0xb8   :  { %66 = vsyncpa [#allocation3], 1 }
  0xb9   :  { %67 = vsyncpa [#allocation4], 1 }

</bundles_post_ra>
